<compile_context>
chip_gen: v5e
topology: v5e:2x2
jax: 0.10.0
libtpu: 0.0.40
codegen_flags: <defaults>
</compile_context>

<pallas_src>
import math

import jax
import jax.numpy as jnp
from jax.experimental import pallas as pl
from jax.experimental.pallas import tpu as pltpu

BN_EPS = 1e-5      # nn.BatchNorm1d default eps
NORM_EPS = 1e-12   # F.normalize default eps


def _round_up(v, m):
    return ((v + m - 1) // m) * m


def _largest_divisor_leq(p, target):
    target = max(1, min(p, target))
    for d in range(target, 0, -1):
        if p % d == 0:
            return d
    return 1


def _make_kernel(norm: bool):
    def kernel(x_ref, gamma_ref, beta_ref, w_ref, feat_ref, logits_ref,
               feat_mxu_sc):
        # x_ref:       (TP, n, C)   part-block activations (resident across k)
        # gamma_ref:   (TP, 1, C)   BN scale
        # beta_ref:    (TP, 1, C)   BN shift
        # w_ref:       (TP, C, TK)  classifier-weight K-tile (streamed per step)
        # feat_ref:    (TP, n, C)   feature output (resident across k)
        # logits_ref:  (TP, n, TK)  logits K-tile output
        # feat_mxu_sc: (TP, n, C)   matmul-ready (bf16) copy of the feature
        kidx = pl.program_id(1)

        # BN + feature normalization once per part block; reused by all K-tiles.
        @pl.when(kidx == 0)
        def _():
            x = x_ref[...].astype(jnp.float32)
            gamma = gamma_ref[...].astype(jnp.float32)
            beta = beta_ref[...].astype(jnp.float32)

            # BatchNorm1d (training mode: batch stats over n, biased variance),
            # folded into a single affine per channel.
            mean = jnp.mean(x, axis=1, keepdims=True)            # (TP, 1, C)
            xc = x - mean
            var = jnp.mean(xc * xc, axis=1, keepdims=True)       # (TP, 1, C)
            y = xc * (gamma * jax.lax.rsqrt(var + BN_EPS)) + beta

            if norm:
                # F.normalize(feature, dim=-1): y * rsqrt(max(sum y^2, eps^2))
                ss = jnp.sum(y * y, axis=-1, keepdims=True)      # (TP, n, 1)
                y = y * jax.lax.rsqrt(jnp.maximum(ss, NORM_EPS * NORM_EPS))

            feat_ref[...] = y.astype(feat_ref.dtype)
            feat_mxu_sc[...] = y.astype(feat_mxu_sc.dtype)

        # Batched per-part matmul on the MXU (bf16 operands, f32 accumulation).
        w = w_ref[...]                                           # (TP, C, TK)
        logits = jnp.einsum('pnc,pck->pnk', feat_mxu_sc[...], w,
                            preferred_element_type=jnp.float32)
        if norm:
            # F.normalize(fc_bin, dim=1) folded into a logits post-scale:
            # feat @ (w * s) == (feat @ w) * s with s the per-column inv-norm.
            wf = w.astype(jnp.float32)
            ws = jnp.sum(wf * wf, axis=1, keepdims=True)         # (TP, 1, TK)
            logits = logits * jax.lax.rsqrt(jnp.maximum(ws, NORM_EPS * NORM_EPS))
        logits_ref[...] = logits.astype(logits_ref.dtype)

    return kernel


def separate_bnnecks_part_major(x_p, gamma, beta, fc_bin, *, norm=True,
                                parts_per_block=None, class_block=None,
                                mxu_dtype=jnp.bfloat16, weight_buffers=None):
    """Part-major entry point (no [n, c, p] layout transposes).

    x_p:    (p, n, c)  activations, part-major
    gamma:  (c * p,)   BatchNorm1d weight (feature index = channel * p + part)
    beta:   (c * p,)   BatchNorm1d bias
    fc_bin: (p, c, k)  classifier weights
    Returns (feature (p, n, c), logits (p, n, k)).
    """
    p, n, c = x_p.shape
    k = fc_bin.shape[-1]
    out_dtype = x_p.dtype

    # ---- tiling choices ------------------------------------------------------
    # Keep >= ~8 steps along the "parallel" part axis so each TensorCore on a
    # v7x megacore gets >= 4 steps of DMA/compute overlap.
    if parts_per_block is None:
        parts_per_block = _largest_divisor_leq(p, max(1, p // 8))
    assert p % parts_per_block == 0, "parts_per_block must divide parts_num"
    tp = parts_per_block
    pb = p // tp

    # Class (K) tiles: multiple of 128 (v5e MXU); 512 default when large
    # (multiple of 256 for v6e/v7x).  Class dim is zero-padded to a tile
    # multiple so logits stores are lane-dense; padding is sliced off outside.
    if class_block is None:
        class_block = min(512, _round_up(k, 128))
    tk = _round_up(class_block, 128)
    k_pad = _round_up(k, tk)
    kb = k_pad // tk

    # Channel padding keeps the feature store lane-dense when c < 128.  The
    # zero-padded channels BN to exactly zero and contribute nothing to the
    # feature norm or the matmul, so semantics are preserved.
    c_pad = _round_up(c, 128)

    # ---- operand layout / padding --------------------------------------------
    # BN params are laid out for x.view(n, c*p): feature index = ch * p + part.
    gamma_t = gamma.reshape(c, p).T.reshape(p, 1, c).astype(jnp.float32)
    beta_t = beta.reshape(c, p).T.reshape(p, 1, c).astype(jnp.float32)

    fc_used = fc_bin
    if k_pad != k:
        fc_used = jnp.pad(fc_used, ((0, 0), (0, 0), (0, k_pad - k)))
    if c_pad != c:
        x_p = jnp.pad(x_p, ((0, 0), (0, 0), (0, c_pad - c)))
        gamma_t = jnp.pad(gamma_t, ((0, 0), (0, 0), (0, c_pad - c)),
                          constant_values=1.0)
        beta_t = jnp.pad(beta_t, ((0, 0), (0, 0), (0, c_pad - c)))
        fc_used = jnp.pad(fc_used, ((0, 0), (0, c_pad - c), (0, 0)))
    # Stream the classifier weights (the dominant HBM read) in the MXU dtype.
    fc_used = fc_used.astype(mxu_dtype)

    # ---- VMEM budget / compiler params ----------------------------------------
    def nbytes(shape, dtype):
        return math.prod(shape) * jnp.dtype(dtype).itemsize

    w_bufs = 2 if weight_buffers is None else weight_buffers
    vmem_needed = (
        2 * nbytes((tp, n, c_pad), x_p.dtype)          # x blocks
        + 4 * nbytes((tp, 1, c_pad), jnp.float32)      # gamma / beta blocks
        + w_bufs * nbytes((tp, c_pad, tk), mxu_dtype)  # weight K-tiles
        + 2 * nbytes((tp, n, c_pad), out_dtype)        # feature output blocks
        + 2 * nbytes((tp, n, tk), out_dtype)           # logits output blocks
        + nbytes((tp, n, c_pad), mxu_dtype)            # feature scratch
    )
    # Derive the scoped-VMEM limit from the actual blocks (+50% headroom).  The
    # default tiles keep this well under 48 MiB, safe on every generation
    # (v7x: 64 MiB physical); v5e/v6e callers can enlarge class_block /
    # parts_per_block and the limit scales with them.
    vmem_limit = max(32 * 1024 * 1024, int(vmem_needed * 1.5) + (1 << 20))

    w_spec_kwargs = {}
    if weight_buffers is not None:
        # Optional deeper pipelining of the (largest) weight stream.
        w_spec_kwargs["pipeline_mode"] = pl.Buffered(weight_buffers)

    feat_p, logits_p = pl.pallas_call(
        _make_kernel(norm),
        out_shape=(
            jax.ShapeDtypeStruct((p, n, c_pad), out_dtype),
            jax.ShapeDtypeStruct((p, n, k_pad), out_dtype),
        ),
        grid_spec=pltpu.PrefetchScalarGridSpec(
            num_scalar_prefetch=0,
            grid=(pb, kb),
            in_specs=[
                # x / gamma / beta block indices are independent of k, so the
                # blocks stay resident instead of re-DMAing every K-tile.
                pl.BlockSpec((tp, n, c_pad), lambda i, kk: (i, 0, 0)),
                pl.BlockSpec((tp, 1, c_pad), lambda i, kk: (i, 0, 0)),
                pl.BlockSpec((tp, 1, c_pad), lambda i, kk: (i, 0, 0)),
                pl.BlockSpec((tp, c_pad, tk), lambda i, kk: (i, 0, kk),
                             **w_spec_kwargs),
            ],
            out_specs=[
                pl.BlockSpec((tp, n, c_pad), lambda i, kk: (i, 0, 0)),
                pl.BlockSpec((tp, n, tk), lambda i, kk: (i, 0, kk)),
            ],
            scratch_shapes=[pltpu.VMEM((tp, n, c_pad), mxu_dtype)],
        ),
        compiler_params=pltpu.CompilerParams(
            dimension_semantics=("parallel", "arbitrary"),
            vmem_limit_bytes=vmem_limit,
        ),
    )(x_p, gamma_t, beta_t, fc_used)

    return feat_p[:, :, :c], logits_p[:, :, :k]


def separate_bnnecks(x, gamma, beta, fc_bin, norm=True, **kwargs):
    """x: [n, c, p] (PyTorch layout). Returns (feature [n, c, p], logits [n, class, p]).

    Note: matching the PyTorch interface forces layout transposes around the
    kernel (full HBM read+write each); callers that can stay part-major
    end-to-end should use separate_bnnecks_part_major directly and skip them.
    """
    x_p = jnp.transpose(x, (2, 0, 1))                        # (p, n, c)
    feat_p, logits_p = separate_bnnecks_part_major(
        x_p, gamma, beta, fc_bin, norm=norm, **kwargs)
    feature = jnp.transpose(feat_p, (1, 2, 0))               # [n, c, p]
    logits = jnp.transpose(logits_p, (1, 2, 0))              # [n, class, p]
    return feature, logits


def ref_forward(x, gamma, beta, fc_bin, norm=True):
    """Pure-JAX reference mirroring the PyTorch forward (parallel_BN1d=True, train mode)."""
    n, c, p = x.shape
    xf = x.reshape(n, c * p)
    mean = xf.mean(axis=0)
    var = ((xf - mean) ** 2).mean(axis=0)
    xf = (xf - mean) / jnp.sqrt(var + BN_EPS) * gamma + beta
    feature = jnp.transpose(xf.reshape(n, c, p), (2, 0, 1))  # (p, n, c)
    if norm:
        feature = feature / jnp.maximum(
            jnp.linalg.norm(feature, axis=-1, keepdims=True), NORM_EPS)
        w = fc_bin / jnp.maximum(
            jnp.linalg.norm(fc_bin, axis=1, keepdims=True), NORM_EPS)
    else:
        w = fc_bin
    logits = jnp.einsum('pnc,pck->pnk', feature, w)
    return jnp.transpose(feature, (1, 2, 0)), jnp.transpose(logits, (1, 2, 0))


if __name__ == "__main__":
    # Small shapes consistent with the module: x is [n, c, p]
    n, c, p, class_num = 8, 32, 8, 16

    key = jax.random.PRNGKey(0)
    kx, kw = jax.random.split(key)

    x = jax.random.normal(kx, (n, c, p), dtype=jnp.float32)

    # Deterministic parameter init (mirrors __init__ shapes):
    #   fc_bin: xavier_uniform over [parts_num, in_channels, class_num]
    fan_in = c * class_num
    fan_out = p * class_num
    bound = (6.0 / (fan_in + fan_out)) ** 0.5
    fc_bin = jax.random.uniform(kw, (p, c, class_num), minval=-bound,
                                maxval=bound, dtype=jnp.float32)
    #   BatchNorm1d(in_channels * parts_num): weight=1, bias=0
    gamma = jnp.ones((c * p,), dtype=jnp.float32)
    beta = jnp.zeros((c * p,), dtype=jnp.float32)

    feature, logits = separate_bnnecks(x, gamma, beta, fc_bin, norm=True)
    feature = jax.block_until_ready(feature)
    logits = jax.block_until_ready(logits)

    # Sanity check against the pure-JAX reference.
    ref_feature, ref_logits = ref_forward(x, gamma, beta, fc_bin, norm=True)
    assert feature.shape == (n, c, p)
    assert logits.shape == (n, class_num, p)
    # Feature path is full f32 inside the kernel.
    assert jnp.allclose(feature, ref_feature, atol=1e-5, rtol=1e-5)
    # Logits use bf16 MXU operands (weights streamed as bf16) => looser tolerance.
    assert jnp.allclose(logits, ref_logits, atol=2e-2, rtol=2e-2)

    print("KERNEL_OK")
</pallas_src>

<mosaic_0001>
module attributes {stable_mosaic.version = 11 : i64} {
  func.func @kernel(%arg0: i32, %arg1: i32, %arg2: memref<1x8x128xf32, #tpu.memory_space<vmem>>, %arg3: memref<1x1x128xf32, #tpu.memory_space<vmem>>, %arg4: memref<1x1x128xf32, #tpu.memory_space<vmem>>, %arg5: memref<1x128x128xbf16, #tpu.memory_space<vmem>>, %arg6: memref<1x8x128xf32, #tpu.memory_space<vmem>>, %arg7: memref<1x8x128xf32, #tpu.memory_space<vmem>>, %arg8: memref<1x8x128xbf16, #tpu.memory_space<vmem>>) attributes {dimension_semantics = [#tpu.dimension_semantics<parallel>, #tpu.dimension_semantics<arbitrary>], iteration_bounds = array<i64: 8, 1>, scalar_prefetch = 0 : i64, scratch_operands = 1 : i64, tpu.core_type = #tpu.core_type<tc>, window_params = [{transform_indices = @transform_0, window_bounds = array<i64: 1, 8, 128>}, {transform_indices = @transform_1, window_bounds = array<i64: 1, 1, 128>}, {transform_indices = @transform_2, window_bounds = array<i64: 1, 1, 128>}, {transform_indices = @transform_3, window_bounds = array<i64: 1, 128, 128>}, {transform_indices = @transform_4, window_bounds = array<i64: 1, 8, 128>}, {transform_indices = @transform_5, window_bounds = array<i64: 1, 8, 128>}]} {
    %c0_i32 = arith.constant 0 : i32
    %0 = arith.cmpi eq, %arg1, %c0_i32 : i32
    %1 = arith.extui %0 : i1 to i32
    %c0_i32_0 = arith.constant 0 : i32
    %2 = arith.cmpi ne, %1, %c0_i32_0 : i32
    scf.if %2 {
      %c0_11 = arith.constant 0 : index
      %c0_12 = arith.constant 0 : index
      %c0_13 = arith.constant 0 : index
      %16 = vector.load %arg2[%c0_11, %c0_12, %c0_13] : memref<1x8x128xf32, #tpu.memory_space<vmem>>, vector<1x8x128xf32>
      %c0_14 = arith.constant 0 : index
      %c0_15 = arith.constant 0 : index
      %c0_16 = arith.constant 0 : index
      %17 = vector.load %arg3[%c0_14, %c0_15, %c0_16] : memref<1x1x128xf32, #tpu.memory_space<vmem>>, vector<1x1x128xf32>
      %c0_17 = arith.constant 0 : index
      %c0_18 = arith.constant 0 : index
      %c0_19 = arith.constant 0 : index
      %18 = vector.load %arg4[%c0_17, %c0_18, %c0_19] : memref<1x1x128xf32, #tpu.memory_space<vmem>>, vector<1x1x128xf32>
      %cst_20 = arith.constant dense<0.000000e+00> : vector<1x128xf32>
      %19 = vector.multi_reduction <add>, %16, %cst_20 [1] : vector<1x8x128xf32> to vector<1x128xf32>
      %20 = vector.shape_cast %19 : vector<1x128xf32> to vector<1x1x128xf32>
      %cst_21 = arith.constant 8.000000e+00 : f32
      %21 = vector.broadcast %cst_21 : f32 to vector<1x1x128xf32>
      %22 = arith.divf %20, %21 : vector<1x1x128xf32>
      %23 = vector.broadcast %22 : vector<1x1x128xf32> to vector<1x8x128xf32>
      %24 = arith.subf %16, %23 : vector<1x8x128xf32>
      %25 = arith.mulf %24, %24 : vector<1x8x128xf32>
      %cst_22 = arith.constant dense<0.000000e+00> : vector<1x128xf32>
      %26 = vector.multi_reduction <add>, %25, %cst_22 [1] : vector<1x8x128xf32> to vector<1x128xf32>
      %27 = vector.shape_cast %26 : vector<1x128xf32> to vector<1x1x128xf32>
      %cst_23 = arith.constant 8.000000e+00 : f32
      %28 = vector.broadcast %cst_23 : f32 to vector<1x1x128xf32>
      %29 = arith.divf %27, %28 : vector<1x1x128xf32>
      %cst_24 = arith.constant 9.99999974E-6 : f32
      %30 = vector.broadcast %cst_24 : f32 to vector<1x1x128xf32>
      %31 = arith.addf %29, %30 : vector<1x1x128xf32>
      %32 = math.rsqrt %31 : vector<1x1x128xf32>
      %33 = arith.mulf %17, %32 : vector<1x1x128xf32>
      %34 = vector.broadcast %33 : vector<1x1x128xf32> to vector<1x8x128xf32>
      %35 = arith.mulf %24, %34 : vector<1x8x128xf32>
      %36 = vector.broadcast %18 : vector<1x1x128xf32> to vector<1x8x128xf32>
      %37 = arith.addf %35, %36 : vector<1x8x128xf32>
      %38 = arith.mulf %37, %37 : vector<1x8x128xf32>
      %cst_25 = arith.constant dense<0.000000e+00> : vector<1x8xf32>
      %39 = vector.multi_reduction <add>, %38, %cst_25 [2] : vector<1x8x128xf32> to vector<1x8xf32>
      %40 = vector.shape_cast %39 : vector<1x8xf32> to vector<1x8x1xf32>
      %cst_26 = arith.constant 1.000000e-24 : f32
      %41 = vector.broadcast %cst_26 : f32 to vector<1x8x1xf32>
      %42 = arith.maximumf %40, %41 : vector<1x8x1xf32>
      %43 = math.rsqrt %42 : vector<1x8x1xf32>
      %44 = vector.broadcast %43 : vector<1x8x1xf32> to vector<1x8x128xf32>
      %45 = arith.mulf %37, %44 : vector<1x8x128xf32>
      %c0_27 = arith.constant 0 : index
      %c0_28 = arith.constant 0 : index
      %c0_29 = arith.constant 0 : index
      %46 = vector.load %arg6[%c0_27, %c0_28, %c0_29] : memref<1x8x128xf32, #tpu.memory_space<vmem>>, vector<1x8x128xf32>
      tpu.vector_store %arg6[%c0_27, %c0_28, %c0_29], %45 {strides = array<i32>} : memref<1x8x128xf32, #tpu.memory_space<vmem>>, vector<1x8x128xf32>,
      %47 = arith.truncf %45 : vector<1x8x128xf32> to vector<1x8x128xbf16>
      %c0_30 = arith.constant 0 : index
      %c0_31 = arith.constant 0 : index
      %c0_32 = arith.constant 0 : index
      %48 = vector.load %arg8[%c0_30, %c0_31, %c0_32] : memref<1x8x128xbf16, #tpu.memory_space<vmem>>, vector<1x8x128xbf16>
      tpu.vector_store %arg8[%c0_30, %c0_31, %c0_32], %47 {strides = array<i32>} : memref<1x8x128xbf16, #tpu.memory_space<vmem>>, vector<1x8x128xbf16>,
    } else {
    }
    %c0 = arith.constant 0 : index
    %c0_1 = arith.constant 0 : index
    %c0_2 = arith.constant 0 : index
    %3 = vector.load %arg5[%c0, %c0_1, %c0_2] : memref<1x128x128xbf16, #tpu.memory_space<vmem>>, vector<1x128x128xbf16>
    %c0_3 = arith.constant 0 : index
    %c0_4 = arith.constant 0 : index
    %c0_5 = arith.constant 0 : index
    %4 = vector.load %arg8[%c0_3, %c0_4, %c0_5] : memref<1x8x128xbf16, #tpu.memory_space<vmem>>, vector<1x8x128xbf16>
    "tpu.trace_start"() <{level = 10 : i32, message = "pnc,pck->pnk"}> : () -> ()
    %cst = arith.constant dense<0.000000e+00> : vector<1x8x128xf32>
    %5 = tpu.matmul %4, %3, %cst {dimension_numbers = #tpu.dot_dimension_numbers<[2], [1], [1], [2], [0, 0, 0, 1, 1, 2], [0], [0]>} : vector<1x8x128xbf16>, vector<1x128x128xbf16>, vector<1x8x128xf32> -> vector<1x8x128xf32>
    "tpu.trace_stop"() : () -> ()
    %6 = arith.extf %3 : vector<1x128x128xbf16> to vector<1x128x128xf32>
    %7 = arith.mulf %6, %6 : vector<1x128x128xf32>
    %cst_6 = arith.constant dense<0.000000e+00> : vector<1x128xf32>
    %8 = vector.multi_reduction <add>, %7, %cst_6 [1] : vector<1x128x128xf32> to vector<1x128xf32>
    %9 = vector.shape_cast %8 : vector<1x128xf32> to vector<1x1x128xf32>
    %cst_7 = arith.constant 1.000000e-24 : f32
    %10 = vector.broadcast %cst_7 : f32 to vector<1x1x128xf32>
    %11 = arith.maximumf %9, %10 : vector<1x1x128xf32>
    %12 = math.rsqrt %11 : vector<1x1x128xf32>
    %13 = vector.broadcast %12 : vector<1x1x128xf32> to vector<1x8x128xf32>
    %14 = arith.mulf %5, %13 : vector<1x8x128xf32>
    %c0_8 = arith.constant 0 : index
    %c0_9 = arith.constant 0 : index
    %c0_10 = arith.constant 0 : index
    %15 = vector.load %arg7[%c0_8, %c0_9, %c0_10] : memref<1x8x128xf32, #tpu.memory_space<vmem>>, vector<1x8x128xf32>
    tpu.vector_store %arg7[%c0_8, %c0_9, %c0_10], %14 {strides = array<i32>} : memref<1x8x128xf32, #tpu.memory_space<vmem>>, vector<1x8x128xf32>,
    return
  }
  func.func @transform_0(%arg0: i32, %arg1: i32) -> (i32, i32, i32) {
    %c0_i32 = arith.constant 0 : i32
    %c0_i32_0 = arith.constant 0 : i32
    %c0_i32_1 = arith.constant 0 : i32
    return %arg0, %c0_i32, %c0_i32_0 : i32, i32, i32
  }
  func.func @transform_1(%arg0: i32, %arg1: i32) -> (i32, i32, i32) {
    %c0_i32 = arith.constant 0 : i32
    %c0_i32_0 = arith.constant 0 : i32
    %c0_i32_1 = arith.constant 0 : i32
    return %arg0, %c0_i32, %c0_i32_0 : i32, i32, i32
  }
  func.func @transform_2(%arg0: i32, %arg1: i32) -> (i32, i32, i32) {
    %c0_i32 = arith.constant 0 : i32
    %c0_i32_0 = arith.constant 0 : i32
    %c0_i32_1 = arith.constant 0 : i32
    return %arg0, %c0_i32, %c0_i32_0 : i32, i32, i32
  }
  func.func @transform_3(%arg0: i32, %arg1: i32) -> (i32, i32, i32) {
    %c0_i32 = arith.constant 0 : i32
    %c0_i32_0 = arith.constant 0 : i32
    return %arg0, %c0_i32, %arg1 : i32, i32, i32
  }
  func.func @transform_4(%arg0: i32, %arg1: i32) -> (i32, i32, i32) {
    %c0_i32 = arith.constant 0 : i32
    %c0_i32_0 = arith.constant 0 : i32
    %c0_i32_1 = arith.constant 0 : i32
    return %arg0, %c0_i32, %c0_i32_0 : i32, i32, i32
  }
  func.func @transform_5(%arg0: i32, %arg1: i32) -> (i32, i32, i32) {
    %c0_i32 = arith.constant 0 : i32
    %c0_i32_0 = arith.constant 0 : i32
    return %arg0, %c0_i32, %arg1 : i32, i32, i32
  }
}

</mosaic_0001>

<bundles_post_ra>
// kernel: tpu_custom_call.1
= control target key start
LH: loop header
LB: loop body
LE: loop exit
PB: predicated region body
PF: predicated region fallthrough
CT: control target
= control target key end

     0   :  { %s1450_s0 = inlined_call_operand.hbm [shape: f32[8,8,128], index: 0, kind: input, shape index: {}]   ;;  %s1451_s1 = inlined_call_operand.hbm [shape: f32[8,1,128], index: 1, kind: input, shape index: {}]   ;;  %s1452_s2 = inlined_call_operand.hbm [shape: f32[8,1,128], index: 2, kind: input, shape index: {}]   ;;  %s1453_s3 = inlined_call_operand.hbm [shape: bf16[8,128,128], index: 3, kind: input, shape index: {}]   ;;  %s1454_s4 = inlined_call_operand.hbm [shape: f32[8,8,128], index: 4, kind: output, shape index: {0}]   ;;  %s1455_s5 = inlined_call_operand.hbm [shape: f32[8,8,128], index: 5, kind: output, shape index: {1}]  }
   0x1   :  { %1459 = sst [smem:[#allocation23_spill]] %s1451_s1 }
   0x2   :  { %11 = vsyncpa [#allocation4], 0 }
   0x3   :  { %13 = vsyncpa [#allocation4 + $0x1], 0 }
   0x4   :  { %14 = vsyncpa [#allocation7], 0 }
   0x5   :  { %16 = vsyncpa [#allocation7 + $0x1], 0 }
   0x6   :  { %17 = vsyncpa [#allocation10], 0 }
   0x7   :  { %19 = vsyncpa [#allocation10 + $0x1], 0 }
   0x8   :  { %20 = vsyncpa [#allocation5], 0 }
   0x9   :  { %22 = vsyncpa [#allocation5 + $0x1], 0 }
   0xa   :  { %23 = vsyncpa [#allocation13], 0 }
   0xb   :  { %25 = vsyncpa [#allocation13 + $0x1], 0  ;;  %s1231_s18 = smov 0   ;;  %s1233_s19 = smov 0  }
   0xc   :  { %s1235_s20 = smov 0   ;;  %s1237_s21 = smov 0  }
   0xd   :  { %s1239_s22 = smov 0   ;;  %s1241_s23 = smov 0  }
   0xe LB: > { %1460 = sst [smem:[#allocation19_spill]] %s1184_s20  ;;  %s1262_s24 = sadd.s32 4294967295, %s1196_s23   ;;  %s1196_s23 = sphi %s1241_s23, %s31_s23   ;;  %s1192_s22 = sphi %s1239_s22, %s1478_s22   ;;  %s1188_s21 = sphi %s1237_s21, %s1477_s21   ;;  %s1184_s20 = sphi %s1235_s20, %s1473_s20   ;;  %s1180_s19 = sphi %s1233_s19, %s1476_s19   ;;  %s1176_s18 = sphi %s1231_s18, %s1475_s18  }
   0xf   : > { %s800_s25 = sadd.s32 4294967294, %s1196_s23   ;;  %s43_s26 = sadd.s32 1, %s1192_s22 }
  0x10   : > { %s50_s27 = sadd.s32 1, %s1184_s20  ;;  %p45_p0 = scmp.ge.s32.totalorder %s43_s26, 8 }
  0x11   : > { %p57_p1 = scmp.ne.s32.totalorder %s1184_s20, %s1180_s19  ;;  %p58_p2 = scmp.eq.s32.totalorder %s1196_s23, 0 }
  0x12   : > { %p63_p3 = scmp.ne.s32.totalorder %s1180_s19, %s1176_s18  ;;  %s1480_s26 = smov (%p45_p0, %s43_s26), 0 }
  0x13   : > { %1461 = sst [smem:[#allocation20_spill]] %s1480_s26  ;;  %p1274_p4 = por %p58_p2, %p57_p1 }
  0x14   : > { %p64_p5 = scmp.eq.s32.totalorder %s1262_s24, 0  ;;  %s47_s29 = ssub.s32 %s1192_s22, %s1480_s26 }
  0x15   : > { %p167_p6 = scmp.eq.s32.totalorder %s1262_s24, 7  ;;  %p48_p7 = scmp.eq.s32.totalorder %s47_s29, 0 }
  0x16   : > { %p1282_p8 = por %p64_p5, %p63_p3  ;;  %p173_p10 = scmp.eq.s32.totalorder %s800_s25, 7 }
  0x17   : > { %p1286_p9 = por %p167_p6, %p57_p1  ;;  %p892_p12 = scmp.lt.s32.totalorder %s1196_s23, 8 }
  0x18   : > { %s1291_s7 = scalar_select %p48_p7, %s1184_s20, %s50_s27  }
  0x19   : > { %p1293_p11 = por %p173_p10, %p63_p3  ;;  %s1299_s9 = sand.u32 1, %s1184_s20  }
  0x1a   : > { %1465 = sst [smem:[#allocation21_spill]] %s1291_s7  ;;  %s240_s10 = sand.u32 1, %s1196_s23  }
  0x1b   : > { %s1466_s8 = scalar_select %p1293_p11, 1, 0 }
  0x1c   : > { %p1304_p13 = pnand %p892_p12, %p1274_p4  ;;  %s1469_s1 = sld [smem:[#allocation23_spill]] }
  0x1d   : > { %1467 = sst [smem:[#allocation22_spill]] %s1466_s8  ;;  %s243_s15 = scalar_lea.vmem [#allocation6], %s1299_s9 }
  0x1e   : > { %s250_s16 = sshll.u32 %s243_s15, 4  ;;  %s241_s25 = scalar_lea.sflag [#allocation7], %s240_s10  ;;  %s251_s16 = int_to_ptr.vmem [resolvable:$true] %s250_s16 }
  0x1f   : > { %p808_p0 = scmp.ge.s32.totalorder %s1196_s23, 1  ;;  %p295_p1 = scmp.lt.s32.totalorder %s1196_s23, 9 }
  0x20   : > { %s803_s28 = sshll.u32 %s1299_s9, 3  ;;  %s804_s29 = sshll.u32 %s1192_s22, 3 }
  0x21   : > { %p1317_p2 = pnand %p808_p0, %p295_p1  ;;  %s225_s10 = scalar_lea.vmem [#allocation3], %s803_s28 }
  0x22   : > { %s246_s14 = scalar_lea.hbm %s1469_s1, %s1192_s22  ;;  %s233_s1 = sshll.u32 %s225_s10, 4  ;;  %s234_s1 = int_to_ptr.vmem [resolvable:$true] %s233_s1 }
  0x23   : > { %s248_s17 = sshll.u32 %s246_s14, 4  ;;  %s229_s14 = scalar_lea.hbm %s1450_s0, %s804_s29  ;;  %s249_s17 = int_to_ptr.hbm [resolvable:$true] %s248_s17 }
  0x24   : > { %878 = dma.hbm_to_vmem [thread:$0]  (!%p1304_p13), %s249_s17, 16, %s251_s16, %s241_s25  }
  0x25   : > { %s231_s15 = sshll.u32 %s229_s14, 4  ;;  %s222_s16 = scalar_lea.sflag [#allocation4], %s1299_s9  ;;  %s232_s15 = int_to_ptr.hbm [resolvable:$true] %s231_s15 }
  0x26   : > { %875 = dma.hbm_to_vmem [thread:$0]  (!%p1304_p13), %s232_s15, 128, %s234_s1, %s222_s16  }
  0x27   : > { %s263_s7 = scalar_lea.hbm %s1452_s2, %s1192_s22  ;;  %s260_s8 = scalar_lea.vmem [#allocation8], %s1299_s9 }
  0x28   : > { %s265_s20 = sshll.u32 %s263_s7, 4  ;;  %s267_s12 = sshll.u32 %s260_s8, 4  ;;  %s266_s20 = int_to_ptr.hbm [resolvable:$true] %s265_s20  ;;  %s268_s12 = int_to_ptr.vmem [resolvable:$true] %s267_s12 }
  0x29   : > { %881 = dma.hbm_to_vmem [thread:$0]  (!%p1304_p13), %s266_s20, 16, %s268_s12, %s241_s25  }
  0x2a   : > { %s805_s28 = sshll.u32 %s1299_s9, 6  ;;  %s851_s29 = sshll.u32 %s1192_s22, 6 }
  0x2b   : > { %s284_s10 = scalar_lea.hbm %s1453_s3, %s851_s29  ;;  %s278_s1 = scalar_lea.vmem [#allocation9], %s805_s28 }
  0x2c   : > { %s287_s15 = sshll.u32 %s278_s1, 4  ;;  %s285_s16 = sshll.u32 %s284_s10, 4  ;;  %s288_s15 = int_to_ptr.vmem [resolvable:$true] %s287_s15  ;;  %s286_s16 = int_to_ptr.hbm [resolvable:$true] %s285_s16 }
  0x2d   : > { %s275_s26 = scalar_lea.sflag [#allocation10], %s1299_s9  ;;  %s1198_s7 = smov 64  }
  0x2e   : > { %s1199_s17 = smov 4   ;;  %299 = sbr.rel (%p1317_p2) target bundleno = 407 (0x197), region = 36 }
  0x2f   : > { %884 = dma.hbm_to_vmem [thread:$0]  (!%p1304_p13), %s286_s16, 1024, %s288_s15, %s275_s26, %s1198_s7, %s1198_s7, %s1199_s17  }
  0x30   : > { %s1347_s20 = sand.u32 (!%p1317_p2), 1, %s1180_s19  }
  0x31   : > { %s1350_s8 = sshll.u32 (!%p1317_p2), %s1347_s20, 3  ;;  %s302_s25 = scalar_lea.sflag (!%p1317_p2), [#allocation4], %s1347_s20 }
  0x32   : > { %s305_s12 = scalar_lea.vmem (!%p1317_p2), [#allocation3], %s1350_s8 }
  0x33   : > { %1155 = dma.done.wait (%p1282_p8), %s302_s25, 128  }
  0x34   : > { %1157 = vsyncadd (%p1282_p8), %s302_s25, 4294967168  ;;  %s311_s9 = sand.u32 1, %s1262_s24   ;;  %s314_s27 = scalar_lea.vmem [#allocation6], %s1347_s20 }
  0x35   : > { %s312_s11 = scalar_lea.sflag [#allocation7], %s311_s9 }
  0x36   : > { %1159 = dma.done.wait (%p1282_p8), %s312_s11, 32  }
  0x37   : > { %1161 = vsyncadd (%p1282_p8), %s312_s11, 4294967264  ;;  %s810_s28 = sshll.u32 %s1347_s20, 6  ;;  %s323_s29 = scalar_lea.vmem [#allocation8], %s1347_s20 }
  0x38   : > { %s330_s13 = scalar_lea.sflag [#allocation10], %s1347_s20  ;;  %s1367_s14 = scalar_lea.vmem [#allocation9], %s810_s28 }
  0x39   : > { %1163 = dma.done.wait (%p1282_p8), %s330_s13, 1024  }
  0x3a   : > { %1165 = vsyncadd (%p1282_p8), %s330_s13, 4294966272  ;;  %v1200_v0 = vmov 8.0   ;;  %v383_v2 = vld [vmem:[%s305_s12] sm:$0xff]  ;;  %v384_v30 = vld [vmem:[%s314_s27] sm:$0x1]  ;;  %s371_s24 = scalar_lea.vmem [#allocation11], %s1350_s8 }
  0x3b   : > { %946 = vrcp.f32 %v1200_v0  ;;  %v386_v3 = vrot.slane %v383_v2, 4  ;;  %v945_v35 = vld [vmem:[%s323_s29] ss:$0 sm:$0xff]  ;;  %v859_v39 = vld [vmem:[%s1367_s14 + $0x38] sm:$0xff]  ;;  %v858_v40 = vld [vmem:[%s1367_s14 + $0x30] sm:$0xff]  ;;  %s847_s30 = sshll.u32 %s1188_s21, 3 }
  0x3c   : > { %512 = vmatpush.bf16.msra.mxu0 %v859_v39  ;;  %v857_v41 = vld [vmem:[%s1367_s14 + $0x28] sm:$0xff]  ;;  %v856_v42 = vld [vmem:[%s1367_s14 + $0x20] sm:$0xff]  ;;  %v855_v43 = vld [vmem:[%s1367_s14 + $0x18] sm:$0xff]  ;;  %s607_s15 = scalar_lea.hbm %s1454_s4, %s847_s30  ;;  %s609_s16 = sshll.u32 %s371_s24, 4  ;;  %s610_s16 = int_to_ptr.vmem [resolvable:$true] %s609_s16 }
  0x3d   : > { %v387_v5 = vadd.f32 %v386_v3, %v383_v2  ;;  %v854_v44 = vld [vmem:[%s1367_s14 + $0x10] sm:$0xff]  ;;  %v853_v45 = vld [vmem:[%s1367_s14 + $0x8] sm:$0xff]  ;;  %v852_v46 = vld [vmem:[%s1367_s14] sm:$0xff]  ;;  %s611_s26 = sshll.u32 %s607_s15, 4  ;;  %s592_s7 = scalar_lea.sflag [#allocation5], %s1347_s20  ;;  %s612_s26 = int_to_ptr.hbm [resolvable:$true] %s611_s26 }
  0x3e   : > { %s1088_s17 = sshra.s32 %s612_s26, 4  ;;  %s1094_s11 = scalar_lea.hbm %s1454_s4, 64  ;;  %s1089_s17 = int_to_ptr.hbm [resolvable:$true] %s1088_s17 }
  0x3f   : > { %v388_v7 = vrot.slane %v387_v5, 2  ;;  %s1090_s25 = scalar_lea.hbm %s1089_s17, 8  ;;  %p1095_p6 = scmp.lt.s32.totalorder %s1089_s17, %s1454_s4 }
  0x40   : > { %513 = vmatpush.bf16.msra.mxu0 %v858_v40  ;;  %p1091_p3 = scmp.ne.s32.totalorder %s1089_s17, %s1090_s25  ;;  %p1096_p7 = scmp.lt.s32.totalorder %s1094_s11, %s1090_s25 }
  0x41   : > { %v947_v1 = vpop.eup %946  ;;  %v389_v9 = vadd.f32 %v388_v7, %v387_v5 }
  0x42   : > { %v393_v4 = vmul.f32 8.0, %v947_v1  ;;  %vm397_vm0 = vweird.f32 %v947_v1  ;;  %p1092_p4 = pnand %p1091_p3, %p1286_p9  ;;  %p1097_p8 = por %p1096_p7, %p1095_p6 }
  0x43   : > { %v390_v11 = vrot.slane %v389_v9, 1 }
  0x44   : > { %v394_v6 = vsub.f32 1.0, %v393_v4  ;;  %514 = vmatpush.bf16.msra.mxu0 %v857_v41  ;;  %p1093_p5 = pneg %p1092_p4 }
  0x45   : > { %v391_v13 = vadd.f32 %v390_v11, %v389_v9 }
  0x46   : > { %v395_v8 = vmul.f32 %v947_v1, %v394_v6  ;;  %p1098_p10 = pnand %p1097_p8, %p1093_p5 }
  0x48   : > { %v396_v10 = vadd.f32 %v947_v1, %v395_v8  ;;  %515 = vmatpush.bf16.msra.mxu0 %v856_v42 }
  0x4a   : > { %v398_v12 = vsel %vm397_vm0, %v947_v1, %v396_v10 }
  0x4b   : > { %v399_v14 = vmul.f32 %v398_v12, %v391_v13 }
  0x4c   : > { %516 = vmatpush.bf16.msra.mxu0 %v855_v43 }
  0x4d   : > { %v400_v15 = vsub.f32 %v383_v2, %v399_v14 }
  0x4f   : > { %v401_v16 = vmul.f32 %v400_v15, %v400_v15 }
  0x50   : > { %517 = vmatpush.bf16.msra.mxu0 %v854_v44 }
  0x51   : > { %v402_v17 = vrot.slane %v401_v16, 4 }
  0x53   : > { %v403_v18 = vadd.f32 %v402_v17, %v401_v16 }
  0x54   : > { %518 = vmatpush.bf16.msra.mxu0 %v853_v45 }
  0x55   : > { %v404_v19 = vrot.slane %v403_v18, 2 }
  0x57   : > { %v405_v20 = vadd.f32 %v404_v19, %v403_v18 }
  0x58   : > { %519 = vmatpush.bf16.msra.mxu0 %v852_v46 }
  0x59   : > { %v406_v21 = vrot.slane %v405_v20, 1 }
  0x5b   : > { %v407_v22 = vadd.f32 %v406_v21, %v405_v20 }
  0x5d   : > { %v408_v23 = vmul.f32 %v407_v22, %v398_v12 }
  0x5f   : > { %v409_v24 = vadd.f32 1e-05, %v408_v23 }
  0x61   : > { %948 = vrsqrt.f32 %v409_v24  ;;  %vm416_vm1 = vweird.f32 %v409_v24 }
  0x67   : > { %v949_v25 = vpop.eup %948 }
  0x68   : > { %v411_v26 = vmul.f32 %v949_v25, %v409_v24  ;;  %vm417_vm2 = vweird.f32 %v949_v25 }
  0x69   : > { %vm418_vm3 = vmor %vm416_vm1, %vm417_vm2 }
  0x6a   : > { %v412_v27 = vmul.f32 %v949_v25, %v411_v26 }
  0x6c   : > { %v413_v28 = vmul.f32 0.5, %v412_v27 }
  0x6e   : > { %v414_v29 = vsub.f32 1.5, %v413_v28 }
  0x70   : > { %v415_v31 = vmul.f32 %v949_v25, %v414_v29 }
  0x72   : > { %v419_v32 = vsel %vm418_vm3, %v949_v25, %v415_v31 }
  0x73   : > { %v420_v33 = vmul.f32 %v419_v32, %v384_v30 }
  0x75   : > { %v422_v34 = vperm.slane %v420_v33, 0 }
  0x77   : > { %v424_v36 = vmul.f32 %v422_v34, %v400_v15 }
  0x79   : > { %v428_v37 = vadd.f32 %v945_v35, %v424_v36 }
  0x7b   : > { %v429_v38 = vmul.f32 %v428_v37, %v428_v37 }
  0x7d   : > { %430 = vadd.xlane.f32.xlu0 %v429_v38 }
  0xf0   : > { %v431_v47 = vpop.xlane.xlu0 %430 }
  0xf1   : > { %v432_v48 = vmax.f32 %v431_v47, 1e-24 }
  0xf3   : > { %950 = vrsqrt.f32 %v432_v48  ;;  %vm439_vm5 = vweird.f32 %v432_v48 }
  0xf9   : > { %v951_v49 = vpop.eup %950 }
  0xfa   : > { %v434_v50 = vmul.f32 %v951_v49, %v432_v48  ;;  %vm440_vm4 = vweird.f32 %v951_v49 }
  0xfb   : > { %vm441_vm6 = vmor %vm439_vm5, %vm440_vm4 }
  0xfc   : > { %v435_v51 = vmul.f32 %v951_v49, %v434_v50 }
  0xfe   : > { %v436_v52 = vmul.f32 0.5, %v435_v51 }
 0x100   : > { %v437_v53 = vsub.f32 1.5, %v436_v52 }
 0x102   : > { %v438_v54 = vmul.f32 %v951_v49, %v437_v53 }
 0x104   : > { %v442_v55 = vsel %vm441_vm6, %v951_v49, %v438_v54 }
 0x105   : > { %v443_v56 = vmul.f32 %v442_v55, %v428_v37 }
 0x107   : > { %v445_v57 = vpack.c.bf16 %v443_v56, %v443_v56  ;;  %444 = vst [vmem:[%s371_s24] sm:$0xff] %v443_v56 }
 0x109   : > { %446 = vst [vmem:[#allocation2] sm:$0xf] %v445_v57 }
 0x110   : > { %v463_v58 = vld [vmem:[#allocation2] sm:$0xf] }
 0x111   : > { %520 = vmatmul.bf16.vlgmr.msra.gmra.mxu0 %v463_v58 }
 0x112   : > { %1101 = shalt.err (!%p1098_p10)
}
 0x113   : > { %868 = dma.vmem_to_hbm [thread:$0]  (%p1286_p9), %s610_s16, 128, %s612_s26, %s592_s7   ;;  %v447_v59 = vld [vmem:[%s1367_s14] sm:$0xff]   ;;  %v449_v60 = vld [vmem:[%s1367_s14 + $0x8] sm:$0xff]   ;;  %v451_v2 = vld [vmem:[%s1367_s14 + $0x10] sm:$0xff]  }
 0x114   : > { %v525_v61 = vunpack.c.l.bf16 %v447_v59  ;;  %v526_v62 = vunpack.c.h.bf16 %v447_v59  ;;  %v527_v63 = vunpack.c.l.bf16 %v449_v60  ;;  %v528_v3 = vunpack.c.h.bf16 %v449_v60  ;;  %v453_v9 = vld [vmem:[%s1367_s14 + $0x18] sm:$0xff]   ;;  %v455_v16 = vld [vmem:[%s1367_s14 + $0x20] sm:$0xff]   ;;  %v457_v23 = vld [vmem:[%s1367_s14 + $0x28] sm:$0xff]   ;;  %s378_s24 = scalar_lea.vmem [#allocation12], %s1350_s8  ;;  %s597_s15 = scalar_lea.sflag [#allocation13], %s1347_s20 }
 0x115   : > { %v529_v6 = vunpack.c.l.bf16 %v451_v2  ;;  %v530_v10 = vunpack.c.h.bf16 %v451_v2  ;;  %v531_v13 = vunpack.c.l.bf16 %v453_v9  ;;  %v532_v17 = vunpack.c.h.bf16 %v453_v9  ;;  %v459_v30 = vld [vmem:[%s1367_s14 + $0x30] sm:$0xff]   ;;  %v461_v37 = vld [vmem:[%s1367_s14 + $0x38] sm:$0xff]   ;;  %s622_s14 = scalar_lea.hbm %s1455_s5, %s847_s30  ;;  %s624_s10 = sshll.u32 %s378_s24, 4  ;;  %s625_s10 = int_to_ptr.vmem [resolvable:$true] %s624_s10 }
 0x116   : > { %v541_v0 = vmul.f32 %v525_v61, %v525_v61  ;;  %v542_v1 = vmul.f32 %v526_v62, %v526_v62  ;;  %v543_v4 = vmul.f32 %v527_v63, %v527_v63  ;;  %v544_v7 = vmul.f32 %v528_v3, %v528_v3  ;;  %s626_s1 = sshll.u32 %s622_s14, 4  ;;  %s1122_s30 = scalar_lea.hbm %s1455_s5, 64  ;;  %s627_s1 = int_to_ptr.hbm [resolvable:$true] %s626_s1 }
 0x117   : > { %v545_v11 = vmul.f32 %v529_v6, %v529_v6  ;;  %v546_v14 = vmul.f32 %v530_v10, %v530_v10  ;;  %v547_v18 = vmul.f32 %v531_v13, %v531_v13  ;;  %v533_v20 = vunpack.c.l.bf16 %v455_v16  ;;  %s1116_s16 = sshra.s32 %s627_s1, 4  ;;  %s1117_s16 = int_to_ptr.hbm [resolvable:$true] %s1116_s16 }
 0x118   : > { %v557_v5 = vadd.f32 %v542_v1, %v541_v0  ;;  %v548_v21 = vmul.f32 %v532_v17, %v532_v17  ;;  %v534_v24 = vunpack.c.h.bf16 %v455_v16  ;;  %v535_v27 = vunpack.c.l.bf16 %v457_v23  ;;  %s1118_s26 = scalar_lea.hbm %s1117_s16, 8  ;;  %p1123_p1 = scmp.lt.s32.totalorder %s1117_s16, %s1455_s5 }
 0x119   : > { %v549_v25 = vmul.f32 %v533_v20, %v533_v20  ;;  %v536_v31 = vunpack.c.h.bf16 %v457_v23  ;;  %v537_v34 = vunpack.c.l.bf16 %v459_v30  ;;  %v538_v38 = vunpack.c.h.bf16 %v459_v30  ;;  %p1119_p12 = scmp.ne.s32.totalorder %s1117_s16, %s1118_s26  ;;  %p1124_p2 = scmp.lt.s32.totalorder %s1122_s30, %s1118_s26 }
 0x11a   : > { %v558_v8 = vadd.f32 %v557_v5, %v543_v4  ;;  %v550_v28 = vmul.f32 %v534_v24, %v534_v24  ;;  %v551_v32 = vmul.f32 %v535_v27, %v535_v27  ;;  %v539_v41 = vunpack.c.l.bf16 %v461_v37 }
 0x11b   : > { %v552_v35 = vmul.f32 %v536_v31, %v536_v31  ;;  %v553_v39 = vmul.f32 %v537_v34, %v537_v34  ;;  %v554_v42 = vmul.f32 %v538_v38, %v538_v38  ;;  %v540_v44 = vunpack.c.h.bf16 %v461_v37  ;;  %p1120_p13 = pnand %p1119_p12, %p1286_p9  ;;  %p1125_p3 = por %p1124_p2, %p1123_p1 }
 0x11c   : > { %v559_v12 = vadd.f32 %v558_v8, %v544_v7  ;;  %v555_v45 = vmul.f32 %v539_v41, %v539_v41 }
 0x11d   : > { %v556_v47 = vmul.f32 %v540_v44, %v540_v44  ;;  %p1121_p0 = pneg %p1120_p13 }
 0x11e   : > { %v560_v15 = vadd.f32 %v559_v12, %v545_v11 }
 0x11f   : > { %p1126_p4 = pnand %p1125_p3, %p1121_p0 }
 0x120   : > { %v561_v19 = vadd.f32 %v560_v15, %v546_v14 }
 0x122   : > { %v562_v22 = vadd.f32 %v561_v19, %v547_v18 }
 0x124   : > { %v563_v26 = vadd.f32 %v562_v22, %v548_v21 }
 0x126   : > { %v564_v29 = vadd.f32 %v563_v26, %v549_v25 }
 0x128   : > { %v565_v33 = vadd.f32 %v564_v29, %v550_v28 }
 0x12a   : > { %v566_v36 = vadd.f32 %v565_v33, %v551_v32 }
 0x12c   : > { %v567_v40 = vadd.f32 %v566_v36, %v552_v35 }
 0x12e   : > { %v568_v43 = vadd.f32 %v567_v40, %v553_v39 }
 0x130   : > { %v569_v46 = vadd.f32 %v568_v43, %v554_v42 }
 0x132   : > { %v570_v48 = vadd.f32 %v569_v46, %v555_v45 }
 0x134   : > { %v571_v49 = vadd.f32 %v570_v48, %v556_v47 }
 0x136   : > { %v572_v50 = vrot.slane %v571_v49, 4 }
 0x138   : > { %v573_v51 = vadd.f32 %v572_v50, %v571_v49 }
 0x13a   : > { %v574_v52 = vrot.slane %v573_v51, 2 }
 0x13c   : > { %v575_v53 = vadd.f32 %v574_v52, %v573_v51 }
 0x13e   : > { %v576_v54 = vrot.slane %v575_v53, 1 }
 0x140   : > { %v577_v55 = vadd.f32 %v576_v54, %v575_v53 }
 0x142   : > { %v578_v56 = vmax.f32 %v577_v55, 1e-24 }
 0x144   : > { %952 = vrsqrt.f32 %v578_v56  ;;  %vm585_vm7 = vweird.f32 %v578_v56 }
 0x14a   : > { %v953_v57 = vpop.eup %952 }
 0x14b   : > { %v580_v58 = vmul.f32 %v953_v57, %v578_v56  ;;  %vm586_vm8 = vweird.f32 %v953_v57 }
 0x14c   : > { %vm587_vm9 = vmor %vm585_vm7, %vm586_vm8 }
 0x14d   : > { %v581_v59 = vmul.f32 %v953_v57, %v580_v58 }
 0x14f   : > { %v582_v60 = vmul.f32 0.5, %v581_v59 }
 0x151   : > { %v583_v61 = vsub.f32 1.5, %v582_v60 }
 0x153   : > { %v584_v62 = vmul.f32 %v953_v57, %v583_v61 }
 0x155   : > { %v588_v63 = vsel %vm587_vm9, %v953_v57, %v584_v62 }
 0x18e   : > { %v521_v0 = vpop.f32.mrf.mxu0 }
 0x18f   : > { %v589_v1 = vmul.f32 %v588_v63, %v521_v0 }
 0x191   : > { %590 = vst [vmem:[%s378_s24] sm:$0xff] %v589_v1 }
 0x192   : > { %1129 = shalt.err (!%p1126_p4)
}
 0x193   : > { %869 = dma.vmem_to_hbm [thread:$0]  (%p1286_p9), %s625_s10, 128, %s627_s1, %s597_s15  }
 0x196   : > { %v523_v2 = vpop.f32.mrf.mxu0 }
 0x197 PF: > { %p893_p5 = scmp.ge.s32.totalorder %s1196_s23, 2  ;;  %s638_s25 = sand.u32 1, %s1176_s18  }
 0x198   : > { %s639_s12 = scalar_lea.sflag [#allocation5], %s638_s25 }
 0x199   : > { %p886_p6 = pnand %p893_p5, %p1293_p11 }
 0x19b   : > { %p887_p7 = pneg %p886_p6 }
 0x19d   : > { %1167 = dma.done.wait (%p887_p7), %s639_s12, 128  }
 0x19e   : > { %1169 = vsyncadd (%p887_p7), %s639_s12, 4294967168  ;;  %s649_s9 = scalar_lea.sflag [#allocation13], %s638_s25 }
 0x19f   : > { %1171 = dma.done.wait (%p887_p7), %s649_s9, 128  }
 0x1a0   : > { %1173 = vsyncadd (%p887_p7), %s649_s9, 4294967168  ;;  %s31_s23 = sadd.s32 1, %s1196_s23   ;;  %s1472_s6 = sld [smem:[#allocation19_spill]] }
 0x1a1   : > { %p28_p8 = scmp.ge.s32.totalorder %s31_s23, 10   ;;  %s1473_s20 = sld [smem:[#allocation21_spill]] }
 0x1a2   : > { %s1474_s11 = sld [smem:[#allocation20_spill]]  ;;  %s1475_s18 = smov %s1180_s19 }
 0x1a3   : > { %s1477_s21 = smov %s1192_s22 }
 0x1a4   :  { %30 = sbr.rel (!%p28_p8) target bundleno = 14 (0xe), region = 139 }
 0x1a6   : > { %s1476_s19 = smov %s1472_s6 }
 0x1a8   : > { %s1478_s22 = smov %s1474_s11 }
 0x1a9   :  { %655 = vsyncpa [#allocation4], 1 }
 0x1aa   :  { %657 = vsyncpa [#allocation4 + $0x1], 1 }
 0x1ab   :  { %658 = vsyncpa [#allocation7], 1 }
 0x1ac   :  { %660 = vsyncpa [#allocation7 + $0x1], 1 }
 0x1ad   :  { %661 = vsyncpa [#allocation10], 1 }
 0x1ae   :  { %663 = vsyncpa [#allocation10 + $0x1], 1 }
 0x1af   :  { %664 = vsyncpa [#allocation5], 1 }
 0x1b0   :  { %666 = vsyncpa [#allocation5 + $0x1], 1 }
 0x1b1   :  { %667 = vsyncpa [#allocation13], 1 }
 0x1b2   :  { %669 = vsyncpa [#allocation13 + $0x1], 1 }

</bundles_post_ra>
